<compile_context>
chip_gen: v6e
topology: v6e:2x2x1
jax: 0.10.0
libtpu: 0.0.40
codegen_flags: <defaults>
</compile_context>

<pallas_src>
import jax
import jax.numpy as jnp
from jax.experimental import pallas as pl
from jax.experimental.pallas import tpu as pltpu


_TARGET_BLOCK_BYTES = 6 * 1024 * 1024      # ~6 MiB of x per block
_FEATURE_BLOCK_ELEMS = 512 * 128           # feature-axis chunk when tiling ld
_VMEM_LIMIT_BYTES = 40 * 1024 * 1024       # safe on v5e/v6e (128 MiB) and v7x (64 MiB)


def _affine_kernel(x_ref, scale_ref, bias_ref, o_ref):
    # out = scale * x + bias, computed in f32 and cast back to the I/O dtype.
    # scale/bias blocks are (1, bld) and broadcast over the batch-block rows.
    x = x_ref[...].astype(jnp.float32)
    o_ref[...] = (x * scale_ref[...] + bias_ref[...]).astype(o_ref.dtype)


def _sublane_multiple(itemsize):
    # Sublane packing: 8 rows for 32-bit, 16 for 16-bit, 32 for 8-bit dtypes.
    return max(8, 32 // max(itemsize, 1))


def _choose_blocks(n, ld, itemsize, sub):
    """Pick (bn, bld) block sizes for the flattened (n, ld) view."""
    # Tile the feature axis only when even a minimum-height (sub-row) block of
    # a full row would exceed the target; chunk is a multiple of 128 lanes.
    if sub * ld * itemsize > _TARGET_BLOCK_BYTES:
        bld = min(ld, _FEATURE_BLOCK_ELEMS)
    else:
        bld = ld

    row_bytes = bld * itemsize
    bn = _TARGET_BLOCK_BYTES // max(row_bytes, 1)
    bn = max(sub, (bn // sub) * sub)
    bn = min(bn, n)

    # Megacore (v7x): ensure >= 2 batch grid steps when N is large enough so
    # the "parallel" axis can actually be sharded across both TensorCores.
    if n >= 2 * sub:
        half = (-(-n // 2) + sub - 1) // sub * sub   # ceil(n/2) rounded up to sub
        bn = min(bn, half)
    return bn, bld


def truncation_forward(x, avg_latent, *, max_layer=8, threshold=0.7):
    """x: (N, L, D), avg_latent: (D,). Returns truncated latents, same shape/dtype."""
    assert x.ndim == 3
    n, num_layers, d = x.shape
    dtype = x.dtype
    itemsize = jnp.dtype(dtype).itemsize

    avg = jnp.asarray(avg_latent, jnp.float32).reshape(-1)
    assert avg.shape[0] == d

    # Tiny (L, D) affine coefficients, computed once in plain JAX (f32).
    layer_mask = (jnp.arange(num_layers) < max_layer)[:, None]            # (L, 1)
    thr = jnp.float32(threshold)
    scale = jnp.where(layer_mask, thr, jnp.float32(1.0))                  # (L, 1)
    scale = jnp.broadcast_to(scale, (num_layers, d))                      # (L, D)
    bias = jnp.where(layer_mask,
                     (jnp.float32(1.0) - thr) * avg[None, :],
                     jnp.float32(0.0))                                    # (L, D)

    ld = num_layers * d
    x2 = x.reshape(n, ld)
    scale2 = scale.reshape(1, ld).astype(jnp.float32)
    bias2 = bias.reshape(1, ld).astype(jnp.float32)

    sub = _sublane_multiple(itemsize)
    bn, bld = _choose_blocks(n, ld, itemsize, sub)
    grid = (pl.cdiv(n, bn), pl.cdiv(ld, bld))

    out = pl.pallas_call(
        _affine_kernel,
        out_shape=jax.ShapeDtypeStruct((n, ld), dtype),
        grid_spec=pltpu.PrefetchScalarGridSpec(
            num_scalar_prefetch=0,
            grid=grid,
            in_specs=[
                pl.BlockSpec((bn, bld), lambda i, j: (i, j)),
                pl.BlockSpec((1, bld), lambda i, j: (0, j)),
                pl.BlockSpec((1, bld), lambda i, j: (0, j)),
            ],
            out_specs=pl.BlockSpec((bn, bld), lambda i, j: (i, j)),
        ),
        compiler_params=pltpu.CompilerParams(
            dimension_semantics=("parallel", "parallel"),
            vmem_limit_bytes=_VMEM_LIMIT_BYTES,
        ),
    )(x2, scale2, bias2)
    return out.reshape(n, num_layers, d)


def truncation_reference(x, avg_latent, *, max_layer=8, threshold=0.7):
    avg = jnp.asarray(avg_latent).reshape(1, 1, -1).astype(x.dtype)
    interp = avg + jnp.asarray(threshold, x.dtype) * (x - avg)   # torch.lerp(avg, x, t)
    do_trunc = (jnp.arange(x.shape[1]) < max_layer).reshape(1, -1, 1)
    return jnp.where(do_trunc, interp, x)


if __name__ == "__main__":
    key = jax.random.PRNGKey(0)
    k1, k2, k3 = jax.random.split(key, 3)

    # Case 1: small f32 latents (L*D = 512, lane-dense).
    batch, num_layers, dlatent = 4, 16, 32
    x = jax.random.normal(k1, (batch, num_layers, dlatent), dtype=jnp.float32)
    avg_latent = jax.random.normal(k2, (dlatent,), dtype=jnp.float32)

    out = jax.block_until_ready(
        truncation_forward(x, avg_latent, max_layer=8, threshold=0.7))
    ref = truncation_reference(x, avg_latent, max_layer=8, threshold=0.7)
    assert out.shape == x.shape and out.dtype == x.dtype
    assert jnp.allclose(out, ref, atol=1e-5, rtol=1e-5), float(
        jnp.max(jnp.abs(out - ref)))

    # Case 2: L*D not a multiple of 128 (full-row, non-128-aligned lane axis).
    x2 = jax.random.normal(k3, (2, 10, dlatent), dtype=jnp.float32)
    out2 = jax.block_until_ready(
        truncation_forward(x2, avg_latent, max_layer=8, threshold=0.7))
    ref2 = truncation_reference(x2, avg_latent, max_layer=8, threshold=0.7)
    assert jnp.allclose(out2, ref2, atol=1e-5, rtol=1e-5), float(
        jnp.max(jnp.abs(out2 - ref2)))

    # Case 3: bf16 latents exercise the f32-compute-then-cast path.
    xb = x.astype(jnp.bfloat16)
    outb = jax.block_until_ready(
        truncation_forward(xb, avg_latent, max_layer=8, threshold=0.7))
    refb = truncation_reference(xb, avg_latent, max_layer=8, threshold=0.7)
    assert outb.shape == xb.shape and outb.dtype == jnp.bfloat16
    assert jnp.allclose(outb.astype(jnp.float32), refb.astype(jnp.float32),
                        atol=5e-2, rtol=5e-2)

    print("KERNEL_OK")
</pallas_src>

<mosaic_0001>
module attributes {stable_mosaic.version = 11 : i64} {
  func.func @_affine_kernel(%arg0: i32, %arg1: i32, %arg2: memref<4x512xf32, #tpu.memory_space<vmem>>, %arg3: memref<1x512xf32, #tpu.memory_space<vmem>>, %arg4: memref<1x512xf32, #tpu.memory_space<vmem>>, %arg5: memref<4x512xf32, #tpu.memory_space<vmem>>) attributes {dimension_semantics = [#tpu.dimension_semantics<parallel>, #tpu.dimension_semantics<parallel>], iteration_bounds = array<i64: 1, 1>, scalar_prefetch = 0 : i64, scratch_operands = 0 : i64, tpu.core_type = #tpu.core_type<tc>, window_params = [{transform_indices = @transform_0, window_bounds = array<i64: 4, 512>}, {transform_indices = @transform_1, window_bounds = array<i64: 1, 512>}, {transform_indices = @transform_2, window_bounds = array<i64: 1, 512>}, {transform_indices = @transform_3, window_bounds = array<i64: 4, 512>}]} {
    %c0 = arith.constant 0 : index
    %c0_0 = arith.constant 0 : index
    %0 = vector.load %arg2[%c0, %c0_0] : memref<4x512xf32, #tpu.memory_space<vmem>>, vector<4x512xf32>
    %c0_1 = arith.constant 0 : index
    %c0_2 = arith.constant 0 : index
    %1 = vector.load %arg3[%c0_1, %c0_2] : memref<1x512xf32, #tpu.memory_space<vmem>>, vector<1x512xf32>
    %2 = vector.broadcast %1 : vector<1x512xf32> to vector<4x512xf32>
    %3 = arith.mulf %0, %2 : vector<4x512xf32>
    %c0_3 = arith.constant 0 : index
    %c0_4 = arith.constant 0 : index
    %4 = vector.load %arg4[%c0_3, %c0_4] : memref<1x512xf32, #tpu.memory_space<vmem>>, vector<1x512xf32>
    %5 = vector.broadcast %4 : vector<1x512xf32> to vector<4x512xf32>
    %6 = arith.addf %3, %5 : vector<4x512xf32>
    %c0_5 = arith.constant 0 : index
    %c0_6 = arith.constant 0 : index
    %7 = vector.load %arg5[%c0_5, %c0_6] : memref<4x512xf32, #tpu.memory_space<vmem>>, vector<4x512xf32>
    tpu.vector_store %arg5[%c0_5, %c0_6], %6 {strides = array<i32>} : memref<4x512xf32, #tpu.memory_space<vmem>>, vector<4x512xf32>,
    return
  }
  func.func @transform_0(%arg0: i32, %arg1: i32) -> (i32, i32) {
    %c0_i32 = arith.constant 0 : i32
    return %arg0, %arg1 : i32, i32
  }
  func.func @transform_1(%arg0: i32, %arg1: i32) -> (i32, i32) {
    %c0_i32 = arith.constant 0 : i32
    %c0_i32_0 = arith.constant 0 : i32
    return %c0_i32, %arg1 : i32, i32
  }
  func.func @transform_2(%arg0: i32, %arg1: i32) -> (i32, i32) {
    %c0_i32 = arith.constant 0 : i32
    %c0_i32_0 = arith.constant 0 : i32
    return %c0_i32, %arg1 : i32, i32
  }
  func.func @transform_3(%arg0: i32, %arg1: i32) -> (i32, i32) {
    %c0_i32 = arith.constant 0 : i32
    return %arg0, %arg1 : i32, i32
  }
}

</mosaic_0001>

<bundles_post_ra>
// kernel: tpu_custom_call.1
= control target key start
LH: loop header
LB: loop body
LE: loop exit
PB: predicated region body
PF: predicated region fallthrough
CT: control target
= control target key end

     0   :  { %8 = vsyncpa [#allocation3], 0  ;;  %s244_s0 = inlined_call_operand.hbm [shape: f32[4,512], index: 0, kind: input, shape index: {}]   ;;  %s245_s1 = inlined_call_operand.hbm [shape: f32[1,512], index: 1, kind: input, shape index: {}]   ;;  %s246_s2 = inlined_call_operand.hbm [shape: f32[1,512], index: 2, kind: input, shape index: {}]   ;;  %s247_s3 = inlined_call_operand.hbm [shape: f32[4,512], index: 3, kind: output, shape index: {}]  }
   0x1   :  { %9 = vsyncpa [#allocation6], 0 }
   0x2   :  { %10 = vsyncpa [#allocation4], 0  ;;  %s208_s12 = smov [#allocation5]   ;;  %s209_s14 = smov [#allocation2]  }
   0x3   :  { %s27_s13 = sshll.u32 %s208_s12, 4  ;;  %s17_s15 = sshll.u32 %s209_s14, 4  ;;  %s28_s13 = int_to_ptr.vmem [resolvable:$true] %s27_s13  ;;  %s18_s15 = int_to_ptr.vmem [resolvable:$true] %s17_s15 }
   0x4   :  { %s130_s16 = scalar_lea.vmem %s28_s13, 64  ;;  %p135_p1 = scmp.lt.s32.totalorder %s28_s13, %s28_s13 }
   0x5   :  { %p131_p0 = scmp.ne.s32.totalorder %s28_s13, %s130_s16  ;;  %p136_p2 = scmp.lt.s32.totalorder %s130_s16, %s130_s16 }
   0x7   :  { %p137_p3 = por %p136_p2, %p135_p1 }
   0x9   :  { %p138_p4 = pnand %p137_p3, %p131_p0 }
   0xb   :  { %141 = shalt.err (!%p138_p4)
}
   0xc   :  { %30 = dma.hbm_to_vmem [thread:$0]  %s245_s1, 64, %s28_s13, [#allocation6]  }
   0xd   :  { %s150_s19 = scalar_lea.vmem %s18_s15, 256  ;;  %p155_p6 = scmp.lt.s32.totalorder %s18_s15, %s18_s15 }
   0xe   :  { %p151_p5 = scmp.ne.s32.totalorder %s18_s15, %s150_s19  ;;  %p156_p7 = scmp.lt.s32.totalorder %s150_s19, %s150_s19 }
  0x10   :  { %p157_p8 = por %p156_p7, %p155_p6 }
  0x12   :  { %p158_p9 = pnand %p157_p8, %p151_p5 }
  0x14   :  { %161 = shalt.err (!%p158_p9)
}
  0x15   :  { %20 = dma.hbm_to_vmem [thread:$0]  %s244_s0, 256, %s18_s15, [#allocation3]  }
  0x16   :  { %s210_s22 = smov [#allocation7]  }
  0x17   :  { %s37_s23 = sshll.u32 %s210_s22, 4  ;;  %s38_s23 = int_to_ptr.vmem [resolvable:$true] %s37_s23 }
  0x18   :  { %s170_s24 = scalar_lea.vmem %s38_s23, 64  ;;  %p175_p11 = scmp.lt.s32.totalorder %s38_s23, %s38_s23 }
  0x19   :  { %p171_p10 = scmp.ne.s32.totalorder %s38_s23, %s170_s24  ;;  %p176_p12 = scmp.lt.s32.totalorder %s170_s24, %s170_s24 }
  0x1b   :  { %p177_p13 = por %p176_p12, %p175_p11 }
  0x1d   :  { %p178_p0 = pnand %p177_p13, %p171_p10 }
  0x1f   :  { %181 = shalt.err (!%p178_p0)
}
  0x20   :  { %40 = dma.hbm_to_vmem [thread:$0]  %s246_s2, 64, %s38_s23, [#allocation6]  }
  0x21   :  { %202 = dma.done.wait [#allocation3], 256  }
  0x22   :  { %203 = vsyncadd [#allocation3], 4294967040 }
  0x23   :  { %204 = dma.done.wait [#allocation6], 128  }
  0x24   :  { %205 = vsyncadd [#allocation6], 4294967168  ;;  %v54_v0 = vlaneseq  ;;  %v52_v6 = vld [vmem:[#allocation5] sm:$0xf]  ;;  %v76_v7 = vld [vmem:[#allocation7] sm:$0xf] }
  0x25   :  { %v50_v12 = vld [vmem:[#allocation2] sm:$0xff]  ;;  %v51_v19 = vld [vmem:[#allocation2 + $0x8] sm:$0xff]  ;;  %s211_s0 = smov [#allocation8]  }
  0x26   :  { %v55_v1 = vshrl.u32 %v54_v0, 7  ;;  %s108_s2 = sshll.u32 %s211_s0, 4  ;;  %s109_s2 = int_to_ptr.vmem [resolvable:$true] %s108_s2 }
  0x27   :  { %s182_s26 = scalar_lea.vmem %s109_s2, 256  ;;  %p187_p2 = scmp.lt.s32.totalorder %s109_s2, %s109_s2 }
  0x28   :  { %v56_v2 = vsub.s32 0, %v55_v1  ;;  %v60_v3 = vsub.s32 1, %v55_v1  ;;  %v64_v4 = vsub.s32 2, %v55_v1  ;;  %v68_v5 = vsub.s32 3, %v55_v1  ;;  %p183_p1 = scmp.ne.s32.totalorder %s109_s2, %s182_s26  ;;  %p188_p3 = scmp.lt.s32.totalorder %s182_s26, %s182_s26 }
  0x2a   :  { %v57_v8 = vrot.slane %v52_v6, %v56_v2  ;;  %v61_v9 = vrot.slane %v52_v6, %v60_v3  ;;  %v81_v10 = vrot.slane %v76_v7, %v56_v2  ;;  %v85_v11 = vrot.slane %v76_v7, %v60_v3  ;;  %p189_p4 = por %p188_p3, %p187_p2 }
  0x2b   :  { %v65_v13 = vrot.slane %v52_v6, %v64_v4  ;;  %v69_v14 = vrot.slane %v52_v6, %v68_v5  ;;  %v89_v15 = vrot.slane %v76_v7, %v64_v4  ;;  %v93_v16 = vrot.slane %v76_v7, %v68_v5 }
  0x2c   :  { %v70_v17 = vcombine.low %v57_v8, %v61_v9  ;;  %v94_v18 = vcombine.low %v81_v10, %v85_v11  ;;  %p190_p5 = pnand %p189_p4, %p183_p1 }
  0x2d   :  { %v71_v20 = vcombine.low %v65_v13, %v69_v14  ;;  %v95_v21 = vcombine.low %v89_v15, %v93_v16 }
  0x2e   :  { %v74_v22 = vmul.f32 %v70_v17, %v50_v12 }
  0x2f   :  { %v75_v23 = vmul.f32 %v71_v20, %v51_v19 }
  0x30   :  { %v98_v24 = vadd.f32 %v94_v18, %v74_v22 }
  0x31   :  { %v99_v25 = vadd.f32 %v95_v21, %v75_v23 }
  0x32   :  { %100 = vst [vmem:[#allocation8] sm:$0xff] %v98_v24 }
  0x33   :  { %101 = vst [vmem:[#allocation8 + $0x8] sm:$0xff] %v99_v25 }
  0x34   :  { %193 = shalt.err (!%p190_p5)
}
  0x35   :  { %111 = dma.vmem_to_hbm [thread:$0]  %s109_s2, 256, %s247_s3, [#allocation4]  }
  0x36   :  { %206 = dma.done.wait [#allocation4], 256  }
  0x37   :  { %207 = vsyncadd [#allocation4], 4294967040 }
  0x38   :  { %115 = vsyncpa [#allocation3], 1 }
  0x39   :  { %116 = vsyncpa [#allocation6], 1 }
  0x3a   :  { %117 = vsyncpa [#allocation4], 1 }

</bundles_post_ra>
